<compile_context>
chip_gen: v7x
topology: tpu7x:2x2x1
jax: 0.10.0
libtpu: 0.0.40
codegen_flags: <defaults>
</compile_context>

<pallas_src>
import functools

import jax
import jax.numpy as jnp
from jax.experimental import pallas as pl
from jax.experimental.pallas import tpu as pltpu

LANE = 128     # pad feature dims to multiples of the 128-lane vreg width
ROW_PAD = 128  # pad node dim so the MXU sees >=128 rows


def _round_up(v, m):
    return ((v + m - 1) // m) * m


def _full_spec(shape):
    """Full-array block (single tile resident in VMEM, grid=(1,))."""
    return pl.BlockSpec(shape, lambda i: (0,) * len(shape))


def _pad2(a, rows, cols):
    return jnp.pad(a, ((0, rows - a.shape[0]), (0, cols - a.shape[1])))


# ----------------------------------------------------------------------------
# Fused forward kernel
# ----------------------------------------------------------------------------
def _fused_sgcn_kernel(*refs, n_nodes, n_sgconv, has_ak, mxu_dtype):
    """Whole SGCN forward in one kernel.

    refs = x, [ak], gamma, beta, w_in, b_in, (w_l, b_l)*n_sgconv, w_out, b_out, o.
    Weights arrive already padded + cast to mxu_dtype; biases / gamma / beta in f32.
    """
    f32 = jnp.float32
    mxu = jnp.dtype(mxu_dtype)

    x_ref = refs[0]
    pos = 1
    ak_ref = None
    if has_ak:
        ak_ref = refs[pos]
        pos += 1
    gamma_ref, beta_ref, w_in_ref, b_in_ref = refs[pos:pos + 4]
    layer_refs = refs[pos + 4: pos + 4 + 2 * n_sgconv]
    w_out_ref, b_out_ref, o_ref = refs[-3], refs[-2], refs[-1]

    def mx(a):  # cast only when needed (weights / A^k are already mxu_dtype)
        return a if a.dtype == mxu else a.astype(mxu)

    def mm(a, b):  # MXU matmul with f32 accumulation
        return jnp.dot(mx(a), mx(b), preferred_element_type=f32)

    x = x_ref[...].astype(f32)

    # --- BatchNorm1d, training-mode batch stats, single pass (E[x], E[x^2]).
    # n_nodes is the *unpadded* node count; padded rows of x are zero so the sums are exact.
    # (Single-pass variance is cancellation-prone for |mean| >> std; fine at this tolerance.)
    inv_n = 1.0 / n_nodes
    mean = jnp.sum(x, axis=0, keepdims=True) * inv_n
    ex2 = jnp.sum(x * x, axis=0, keepdims=True) * inv_n
    var = jnp.maximum(ex2 - mean * mean, 0.0)             # biased variance
    scale = gamma_ref[...] * jax.lax.rsqrt(var + 1e-5)    # (1, Fin_p)
    shift = beta_ref[...] - mean * scale                  # (1, Fin_p)

    # --- Fold BN into in_conv: W_eff = diag(scale) @ W_in, b_eff = b_in + shift @ W_in.
    # Built via a broadcasted-iota diagonal so no lane<->sublane relayout is needed; the two
    # extra Fin_p^2 x Fh_p f32 matmuls are negligible next to the N_p^2 propagation matmuls.
    fin_p = w_in_ref.shape[0]
    ii = jax.lax.broadcasted_iota(jnp.int32, (fin_p, fin_p), 0)
    jj = jax.lax.broadcasted_iota(jnp.int32, (fin_p, fin_p), 1)
    on_diag = ii == jj
    w_in = w_in_ref[...].astype(f32)
    w_eff = jnp.dot(jnp.where(on_diag, scale, 0.0), w_in, preferred_element_type=f32)
    b_eff = b_in_ref[...] + jnp.sum(
        jnp.dot(jnp.where(on_diag, shift, 0.0), w_in, preferred_element_type=f32),
        axis=0, keepdims=True)

    # --- in_conv + ReLU.  (dropout=0.0 -> identity; layer_norm=False -> no LayerNorm.)
    # h kept in mxu_dtype between layers: elementwise math in f32 vregs, storage in bf16.
    h = mx(jnp.maximum(mm(x, w_eff) + b_eff, 0.0))

    # --- SGConv layers: SGC is linear, so tanh(A^k (h W) + b) == tanh(A^k (h) W + b);
    # project first, then propagate once with the precomputed A^k (DMA'd in bf16).
    for l in range(n_sgconv):
        w_ref, b_ref = layer_refs[2 * l], layer_refs[2 * l + 1]
        y = mm(h, w_ref[...])
        if ak_ref is not None:
            y = mm(ak_ref[...], y)
        h = mx(jnp.tanh(y + b_ref[...]))

    # --- out_conv (logits, no activation); store is lane-dense (128-wide).
    o_ref[...] = (mm(h, w_out_ref[...]) + b_out_ref[...]).astype(o_ref.dtype)


# ----------------------------------------------------------------------------
# One-time preparation (outside the per-call path)
# ----------------------------------------------------------------------------
def prepare_sgcn_params(params, mxu_dtype=jnp.bfloat16):
    """Pad + cast all weights ONCE.  Returns (flat tuple of arrays, static metadata)."""
    w_in, b_in = params["in_conv"]
    w_out, b_out = params["out_conv"]
    fin, fout = w_in.shape[0], w_out.shape[1]
    fin_p = _round_up(fin, LANE)

    def pad_wb(w, b):
        i, o = w.shape
        ip, op = _round_up(i, LANE), _round_up(o, LANE)
        return (_pad2(w, ip, op).astype(mxu_dtype),                  # weight in MXU dtype
                _pad2(b.reshape(1, o).astype(jnp.float32), 1, op))   # bias stays f32

    weights = [
        _pad2(params["bn_gamma"].reshape(1, fin).astype(jnp.float32), 1, fin_p),
        _pad2(params["bn_beta"].reshape(1, fin).astype(jnp.float32), 1, fin_p),
        *pad_wb(w_in, b_in),
    ]
    for (w, b) in params["layers"]:
        weights += list(pad_wb(w, b))
    weights += list(pad_wb(w_out, b_out))
    meta = dict(fin=fin, fout=fout, n_sgconv=len(params["layers"]))
    return tuple(weights), meta


def prepare_adj_power(adj, k, mxu_dtype=jnp.bfloat16):
    """Pad adj and precompute A^k ONCE (f32 squarings, no bf16 error compounding),
    then cast to the MXU dtype so the kernel DMAs half the bytes."""
    n = adj.shape[0]
    n_p = _round_up(max(n, ROW_PAD), ROW_PAD)
    adj_p = _pad2(adj.astype(jnp.float32), n_p, n_p)
    ak = jnp.linalg.matrix_power(adj_p, k)
    return ak.astype(mxu_dtype)


# ----------------------------------------------------------------------------
# Steady-state forward: single fused pallas_call
# ----------------------------------------------------------------------------
def sgcn_forward(x, ak_p, weights, *, fin, fout, n_sgconv,
                 mxu_dtype=jnp.bfloat16, out_dtype=jnp.float32):
    """Fused SGCN forward on prepared (padded, cast) weights and precomputed A^k."""
    n = x.shape[0]
    has_ak = (ak_p is not None) and (n_sgconv > 0)
    n_p = ak_p.shape[0] if ak_p is not None else _round_up(max(n, ROW_PAD), ROW_PAD)
    fin_p = _round_up(fin, LANE)
    fout_p = _round_up(fout, LANE)

    # Only x needs per-call padding (tiny N x Fin copy); everything else is pre-padded.
    x_p = _pad2(x.astype(jnp.float32), n_p, fin_p)

    operands = [x_p]
    if has_ak:
        operands.append(ak_p)
    operands += list(weights)

    kern = functools.partial(_fused_sgcn_kernel, n_nodes=n, n_sgconv=n_sgconv,
                             has_ak=has_ak, mxu_dtype=mxu_dtype)

    # Explicit VMEM budget: generous headroom over resident bytes, clamped to 48 MiB so the
    # same code stays safe on v7x (64 MiB physical) and above v5e's 16 MiB scoped default.
    needed = sum(int(a.size) * a.dtype.itemsize for a in operands)
    needed += n_p * fout_p * jnp.dtype(out_dtype).itemsize
    vmem_limit = int(min(max(4 * needed, 8 << 20), 48 << 20))

    # TODO(synk): for large N, split the node-row dim into a "parallel" grid axis (row-tile
    # x/h/out and A^k rows, replicate the tiny weights, per-layer barrier on h), with tiles
    # sized to 256-multiples on v6e/v7x (128 on v5e) and re-budgeted for v7x's 64 MiB VMEM.
    out_p = pl.pallas_call(
        kern,
        out_shape=jax.ShapeDtypeStruct((n_p, fout_p), out_dtype),
        grid=(1,),
        in_specs=[_full_spec(a.shape) for a in operands],
        out_specs=_full_spec((n_p, fout_p)),
        compiler_params=pltpu.CompilerParams(
            dimension_semantics=("arbitrary",),
            vmem_limit_bytes=vmem_limit),
    )(*operands)
    return out_p[:n, :fout]


# ----------------------------------------------------------------------------
# Model: parameter init + pure-JAX reference + adj normalization
# ----------------------------------------------------------------------------
def init_linear(key, fin, fout):
    # PyTorch nn.Linear default init: U(-1/sqrt(fin), 1/sqrt(fin)) for W and b.
    kw, kb = jax.random.split(key)
    bound = 1.0 / jnp.sqrt(fin)
    w = jax.random.uniform(kw, (fin, fout), jnp.float32, -bound, bound)  # (in, out)
    b = jax.random.uniform(kb, (fout,), jnp.float32, -bound, bound)
    return w, b


def init_sgcn_params(key, in_features, hidden_features, out_features, n_layers):
    if isinstance(hidden_features, int):
        hidden_features = [hidden_features] * (n_layers - 1)
    keys = jax.random.split(key, n_layers + 1)
    return {
        "bn_gamma": jnp.ones((in_features,), jnp.float32),
        "bn_beta": jnp.zeros((in_features,), jnp.float32),
        "in_conv": init_linear(keys[0], in_features, hidden_features[0]),
        "layers": [
            init_linear(keys[1 + i], hidden_features[i], hidden_features[i + 1])
            for i in range(n_layers - 2)
        ],
        "out_conv": init_linear(keys[-1], hidden_features[-1], out_features),
    }


def sgcn_reference(params, x, adj, k=4):
    # Pure-JAX f32 reference mirroring the PyTorch forward.
    mean = jnp.mean(x, axis=0, keepdims=True)
    var = jnp.mean((x - mean) ** 2, axis=0, keepdims=True)
    h = ((x - mean) * jax.lax.rsqrt(var + 1e-5)
         * params["bn_gamma"][None, :] + params["bn_beta"][None, :])
    w, b = params["in_conv"]
    h = jnp.maximum(h @ w + b, 0.0)
    for (w, b) in params["layers"]:
        z = h
        for _ in range(k):
            z = adj @ z
        h = jnp.tanh(z @ w + b)
    w, b = params["out_conv"]
    return h @ w + b


def gcn_adj_norm(adj):
    # GCNAdjNorm: D^{-1/2} (A + I) D^{-1/2}, dense.
    n = adj.shape[0]
    a = adj + jnp.eye(n, dtype=adj.dtype)
    deg = jnp.sum(a, axis=1)
    d_inv_sqrt = jnp.where(deg > 0, 1.0 / jnp.sqrt(deg), 0.0)
    return a * d_inv_sqrt[:, None] * d_inv_sqrt[None, :]


# ----------------------------------------------------------------------------
if __name__ == "__main__":
    key = jax.random.PRNGKey(0)
    k_feat, k_adj, k_param = jax.random.split(key, 3)

    # Small graph: N nodes, in -> hidden -> hidden -> out (n_layers = 3).
    N = 64
    in_features, hidden_features, out_features = 16, 32, 8
    n_layers, k_hop = 3, 4

    x = jax.random.normal(k_feat, (N, in_features), jnp.float32)

    # Random symmetric adjacency, then GCN normalization (dense stand-in for sparse adj).
    raw = (jax.random.uniform(k_adj, (N, N)) < 0.1).astype(jnp.float32)
    raw = jnp.maximum(raw, raw.T)
    adj = gcn_adj_norm(raw)

    params = init_sgcn_params(k_param, in_features, hidden_features,
                              out_features, n_layers)

    # One-time preparation (outside the steady-state path): pad/cast weights, precompute A^k.
    mxu_dtype = jnp.bfloat16
    weights, meta = prepare_sgcn_params(params, mxu_dtype=mxu_dtype)
    ak_p = jax.block_until_ready(prepare_adj_power(adj, k_hop, mxu_dtype=mxu_dtype))

    fwd = jax.jit(functools.partial(sgcn_forward, mxu_dtype=mxu_dtype,
                                    out_dtype=jnp.float32, **meta))
    out = jax.block_until_ready(fwd(x, ak_p, weights))
    assert out.shape == (N, out_features)

    ref = sgcn_reference(params, x, adj, k=k_hop)
    assert bool(jnp.all(jnp.isfinite(out)))
    assert jnp.allclose(out, ref, atol=5e-2, rtol=5e-2), float(jnp.max(jnp.abs(out - ref)))
    print("KERNEL_OK")
</pallas_src>

<mosaic_0001>
module attributes {stable_mosaic.version = 11 : i64} {
  func.func @_fused_sgcn_kernel(%arg0: i32, %arg1: memref<128x128xf32, #tpu.memory_space<vmem>>, %arg2: memref<128x128xbf16, #tpu.memory_space<vmem>>, %arg3: memref<1x128xf32, #tpu.memory_space<vmem>>, %arg4: memref<1x128xf32, #tpu.memory_space<vmem>>, %arg5: memref<128x128xbf16, #tpu.memory_space<vmem>>, %arg6: memref<1x128xf32, #tpu.memory_space<vmem>>, %arg7: memref<128x128xbf16, #tpu.memory_space<vmem>>, %arg8: memref<1x128xf32, #tpu.memory_space<vmem>>, %arg9: memref<128x128xbf16, #tpu.memory_space<vmem>>, %arg10: memref<1x128xf32, #tpu.memory_space<vmem>>, %arg11: memref<128x128xf32, #tpu.memory_space<vmem>>) attributes {dimension_semantics = [#tpu.dimension_semantics<arbitrary>], iteration_bounds = array<i64: 1>, scalar_prefetch = 0 : i64, scratch_operands = 0 : i64, tpu.core_type = #tpu.core_type<tc>, window_params = [{pipeline_mode = #tpu.pipeline_mode<synchronous>, transform_indices = @transform_0, window_bounds = array<i64: 128, 128>}, {pipeline_mode = #tpu.pipeline_mode<synchronous>, transform_indices = @transform_1, window_bounds = array<i64: 128, 128>}, {pipeline_mode = #tpu.pipeline_mode<synchronous>, transform_indices = @transform_2, window_bounds = array<i64: 1, 128>}, {pipeline_mode = #tpu.pipeline_mode<synchronous>, transform_indices = @transform_3, window_bounds = array<i64: 1, 128>}, {pipeline_mode = #tpu.pipeline_mode<synchronous>, transform_indices = @transform_4, window_bounds = array<i64: 128, 128>}, {pipeline_mode = #tpu.pipeline_mode<synchronous>, transform_indices = @transform_5, window_bounds = array<i64: 1, 128>}, {pipeline_mode = #tpu.pipeline_mode<synchronous>, transform_indices = @transform_6, window_bounds = array<i64: 128, 128>}, {pipeline_mode = #tpu.pipeline_mode<synchronous>, transform_indices = @transform_7, window_bounds = array<i64: 1, 128>}, {pipeline_mode = #tpu.pipeline_mode<synchronous>, transform_indices = @transform_8, window_bounds = array<i64: 128, 128>}, {pipeline_mode = #tpu.pipeline_mode<synchronous>, transform_indices = @transform_9, window_bounds = array<i64: 1, 128>}, {pipeline_mode = #tpu.pipeline_mode<synchronous>, transform_indices = @transform_10, window_bounds = array<i64: 128, 128>}]} {
    %c0 = arith.constant 0 : index
    %c0_0 = arith.constant 0 : index
    %0 = vector.load %arg1[%c0, %c0_0] : memref<128x128xf32, #tpu.memory_space<vmem>>, vector<128x128xf32>
    %cst = arith.constant dense<0.000000e+00> : vector<128xf32>
    %1 = vector.multi_reduction <add>, %0, %cst [0] : vector<128x128xf32> to vector<128xf32>
    %2 = vector.shape_cast %1 : vector<128xf32> to vector<1x128xf32>
    %cst_1 = arith.constant 1.562500e-02 : f32
    %3 = vector.broadcast %cst_1 : f32 to vector<1x128xf32>
    %4 = arith.mulf %2, %3 : vector<1x128xf32>
    %5 = arith.mulf %0, %0 : vector<128x128xf32>
    %cst_2 = arith.constant dense<0.000000e+00> : vector<128xf32>
    %6 = vector.multi_reduction <add>, %5, %cst_2 [0] : vector<128x128xf32> to vector<128xf32>
    %7 = vector.shape_cast %6 : vector<128xf32> to vector<1x128xf32>
    %cst_3 = arith.constant 1.562500e-02 : f32
    %8 = vector.broadcast %cst_3 : f32 to vector<1x128xf32>
    %9 = arith.mulf %7, %8 : vector<1x128xf32>
    %10 = arith.mulf %4, %4 : vector<1x128xf32>
    %11 = arith.subf %9, %10 : vector<1x128xf32>
    %cst_4 = arith.constant 0.000000e+00 : f32
    %12 = vector.broadcast %cst_4 : f32 to vector<1x128xf32>
    %13 = arith.maximumf %11, %12 : vector<1x128xf32>
    %c0_5 = arith.constant 0 : index
    %c0_6 = arith.constant 0 : index
    %14 = vector.load %arg3[%c0_5, %c0_6] : memref<1x128xf32, #tpu.memory_space<vmem>>, vector<1x128xf32>
    %cst_7 = arith.constant 9.99999974E-6 : f32
    %15 = vector.broadcast %cst_7 : f32 to vector<1x128xf32>
    %16 = arith.addf %13, %15 : vector<1x128xf32>
    %17 = math.rsqrt %16 : vector<1x128xf32>
    %18 = arith.mulf %14, %17 : vector<1x128xf32>
    %c0_8 = arith.constant 0 : index
    %c0_9 = arith.constant 0 : index
    %19 = vector.load %arg4[%c0_8, %c0_9] : memref<1x128xf32, #tpu.memory_space<vmem>>, vector<1x128xf32>
    %20 = arith.mulf %4, %18 : vector<1x128xf32>
    %21 = arith.subf %19, %20 : vector<1x128xf32>
    %22 = tpu.iota {dimensions = array<i32: 0>} : vector<128x128xi32>
    %23 = tpu.iota {dimensions = array<i32: 1>} : vector<128x128xi32>
    %24 = arith.cmpi eq, %22, %23 : vector<128x128xi32>
    %c0_10 = arith.constant 0 : index
    %c0_11 = arith.constant 0 : index
    %25 = vector.load %arg5[%c0_10, %c0_11] : memref<128x128xbf16, #tpu.memory_space<vmem>>, vector<128x128xbf16>
    %26 = arith.extf %25 : vector<128x128xbf16> to vector<128x128xf32>
    %cst_12 = arith.constant 0.000000e+00 : f32
    %27 = vector.shape_cast %18 : vector<1x128xf32> to vector<1x128xf32>
    %28 = vector.broadcast %27 : vector<1x128xf32> to vector<128x128xf32>
    %29 = vector.broadcast %cst_12 : f32 to vector<128x128xf32>
    %30 = arith.select %24, %28, %29 : vector<128x128xi1>, vector<128x128xf32>
    %cst_13 = arith.constant dense<0.000000e+00> : vector<128x128xf32>
    %31 = tpu.matmul %30, %26, %cst_13 {dimension_numbers = #tpu.dot_dimension_numbers<[1], [0], [0], [1], [0, 0, 1, 1], [], []>} : vector<128x128xf32>, vector<128x128xf32>, vector<128x128xf32> -> vector<128x128xf32>
    %c0_14 = arith.constant 0 : index
    %c0_15 = arith.constant 0 : index
    %32 = vector.load %arg6[%c0_14, %c0_15] : memref<1x128xf32, #tpu.memory_space<vmem>>, vector<1x128xf32>
    %cst_16 = arith.constant 0.000000e+00 : f32
    %33 = vector.shape_cast %21 : vector<1x128xf32> to vector<1x128xf32>
    %34 = vector.broadcast %33 : vector<1x128xf32> to vector<128x128xf32>
    %35 = vector.broadcast %cst_16 : f32 to vector<128x128xf32>
    %36 = arith.select %24, %34, %35 : vector<128x128xi1>, vector<128x128xf32>
    %cst_17 = arith.constant dense<0.000000e+00> : vector<128x128xf32>
    %37 = tpu.matmul %36, %26, %cst_17 {dimension_numbers = #tpu.dot_dimension_numbers<[1], [0], [0], [1], [0, 0, 1, 1], [], []>} : vector<128x128xf32>, vector<128x128xf32>, vector<128x128xf32> -> vector<128x128xf32>
    %cst_18 = arith.constant dense<0.000000e+00> : vector<128xf32>
    %38 = vector.multi_reduction <add>, %37, %cst_18 [0] : vector<128x128xf32> to vector<128xf32>
    %39 = vector.shape_cast %38 : vector<128xf32> to vector<1x128xf32>
    %40 = arith.addf %32, %39 : vector<1x128xf32>
    %41 = arith.truncf %0 : vector<128x128xf32> to vector<128x128xbf16>
    %42 = arith.truncf %31 : vector<128x128xf32> to vector<128x128xbf16>
    %cst_19 = arith.constant dense<0.000000e+00> : vector<128x128xf32>
    %43 = tpu.matmul %41, %42, %cst_19 {dimension_numbers = #tpu.dot_dimension_numbers<[1], [0], [0], [1], [0, 0, 1, 1], [], []>} : vector<128x128xbf16>, vector<128x128xbf16>, vector<128x128xf32> -> vector<128x128xf32>
    %44 = vector.broadcast %40 : vector<1x128xf32> to vector<128x128xf32>
    %45 = arith.addf %43, %44 : vector<128x128xf32>
    %cst_20 = arith.constant 0.000000e+00 : f32
    %46 = vector.broadcast %cst_20 : f32 to vector<128x128xf32>
    %47 = arith.maximumf %45, %46 : vector<128x128xf32>
    %48 = arith.truncf %47 : vector<128x128xf32> to vector<128x128xbf16>
    %c0_21 = arith.constant 0 : index
    %c0_22 = arith.constant 0 : index
    %49 = vector.load %arg7[%c0_21, %c0_22] : memref<128x128xbf16, #tpu.memory_space<vmem>>, vector<128x128xbf16>
    %cst_23 = arith.constant dense<0.000000e+00> : vector<128x128xf32>
    %50 = tpu.matmul %48, %49, %cst_23 {dimension_numbers = #tpu.dot_dimension_numbers<[1], [0], [0], [1], [0, 0, 1, 1], [], []>} : vector<128x128xbf16>, vector<128x128xbf16>, vector<128x128xf32> -> vector<128x128xf32>
    %c0_24 = arith.constant 0 : index
    %c0_25 = arith.constant 0 : index
    %51 = vector.load %arg2[%c0_24, %c0_25] : memref<128x128xbf16, #tpu.memory_space<vmem>>, vector<128x128xbf16>
    %52 = arith.truncf %50 : vector<128x128xf32> to vector<128x128xbf16>
    %cst_26 = arith.constant dense<0.000000e+00> : vector<128x128xf32>
    %53 = tpu.matmul %51, %52, %cst_26 {dimension_numbers = #tpu.dot_dimension_numbers<[1], [0], [0], [1], [0, 0, 1, 1], [], []>} : vector<128x128xbf16>, vector<128x128xbf16>, vector<128x128xf32> -> vector<128x128xf32>
    %c0_27 = arith.constant 0 : index
    %c0_28 = arith.constant 0 : index
    %54 = vector.load %arg8[%c0_27, %c0_28] : memref<1x128xf32, #tpu.memory_space<vmem>>, vector<1x128xf32>
    %55 = vector.broadcast %54 : vector<1x128xf32> to vector<128x128xf32>
    %56 = arith.addf %53, %55 : vector<128x128xf32>
    %57 = math.tanh %56 : vector<128x128xf32>
    %58 = arith.truncf %57 : vector<128x128xf32> to vector<128x128xbf16>
    %c0_29 = arith.constant 0 : index
    %c0_30 = arith.constant 0 : index
    %59 = vector.load %arg9[%c0_29, %c0_30] : memref<128x128xbf16, #tpu.memory_space<vmem>>, vector<128x128xbf16>
    %cst_31 = arith.constant dense<0.000000e+00> : vector<128x128xf32>
    %60 = tpu.matmul %58, %59, %cst_31 {dimension_numbers = #tpu.dot_dimension_numbers<[1], [0], [0], [1], [0, 0, 1, 1], [], []>} : vector<128x128xbf16>, vector<128x128xbf16>, vector<128x128xf32> -> vector<128x128xf32>
    %c0_32 = arith.constant 0 : index
    %c0_33 = arith.constant 0 : index
    %61 = vector.load %arg10[%c0_32, %c0_33] : memref<1x128xf32, #tpu.memory_space<vmem>>, vector<1x128xf32>
    %62 = vector.broadcast %61 : vector<1x128xf32> to vector<128x128xf32>
    %63 = arith.addf %60, %62 : vector<128x128xf32>
    %c0_34 = arith.constant 0 : index
    %c0_35 = arith.constant 0 : index
    %64 = vector.load %arg11[%c0_34, %c0_35] : memref<128x128xf32, #tpu.memory_space<vmem>>, vector<128x128xf32>
    tpu.vector_store %arg11[%c0_34, %c0_35], %63 {strides = array<i32>} : memref<128x128xf32, #tpu.memory_space<vmem>>, vector<128x128xf32>,
    return
  }
  func.func @transform_0(%arg0: i32) -> (i32, i32) {
    %c0_i32 = arith.constant 0 : i32
    %c0_i32_0 = arith.constant 0 : i32
    %c0_i32_1 = arith.constant 0 : i32
    return %c0_i32, %c0_i32_0 : i32, i32
  }
  func.func @transform_1(%arg0: i32) -> (i32, i32) {
    %c0_i32 = arith.constant 0 : i32
    %c0_i32_0 = arith.constant 0 : i32
    %c0_i32_1 = arith.constant 0 : i32
    return %c0_i32, %c0_i32_0 : i32, i32
  }
  func.func @transform_2(%arg0: i32) -> (i32, i32) {
    %c0_i32 = arith.constant 0 : i32
    %c0_i32_0 = arith.constant 0 : i32
    %c0_i32_1 = arith.constant 0 : i32
    return %c0_i32, %c0_i32_0 : i32, i32
  }
  func.func @transform_3(%arg0: i32) -> (i32, i32) {
    %c0_i32 = arith.constant 0 : i32
    %c0_i32_0 = arith.constant 0 : i32
    %c0_i32_1 = arith.constant 0 : i32
    return %c0_i32, %c0_i32_0 : i32, i32
  }
  func.func @transform_4(%arg0: i32) -> (i32, i32) {
    %c0_i32 = arith.constant 0 : i32
    %c0_i32_0 = arith.constant 0 : i32
    %c0_i32_1 = arith.constant 0 : i32
    return %c0_i32, %c0_i32_0 : i32, i32
  }
  func.func @transform_5(%arg0: i32) -> (i32, i32) {
    %c0_i32 = arith.constant 0 : i32
    %c0_i32_0 = arith.constant 0 : i32
    %c0_i32_1 = arith.constant 0 : i32
    return %c0_i32, %c0_i32_0 : i32, i32
  }
  func.func @transform_6(%arg0: i32) -> (i32, i32) {
    %c0_i32 = arith.constant 0 : i32
    %c0_i32_0 = arith.constant 0 : i32
    %c0_i32_1 = arith.constant 0 : i32
    return %c0_i32, %c0_i32_0 : i32, i32
  }
  func.func @transform_7(%arg0: i32) -> (i32, i32) {
    %c0_i32 = arith.constant 0 : i32
    %c0_i32_0 = arith.constant 0 : i32
    %c0_i32_1 = arith.constant 0 : i32
    return %c0_i32, %c0_i32_0 : i32, i32
  }
  func.func @transform_8(%arg0: i32) -> (i32, i32) {
    %c0_i32 = arith.constant 0 : i32
    %c0_i32_0 = arith.constant 0 : i32
    %c0_i32_1 = arith.constant 0 : i32
    return %c0_i32, %c0_i32_0 : i32, i32
  }
  func.func @transform_9(%arg0: i32) -> (i32, i32) {
    %c0_i32 = arith.constant 0 : i32
    %c0_i32_0 = arith.constant 0 : i32
    %c0_i32_1 = arith.constant 0 : i32
    return %c0_i32, %c0_i32_0 : i32, i32
  }
  func.func @transform_10(%arg0: i32) -> (i32, i32) {
    %c0_i32 = arith.constant 0 : i32
    %c0_i32_0 = arith.constant 0 : i32
    %c0_i32_1 = arith.constant 0 : i32
    return %c0_i32, %c0_i32_0 : i32, i32
  }
}

</mosaic_0001>

<bundles_post_ra>
// kernel: sgcn_forward.1
= control target key start
LH: loop header
LB: loop body
LE: loop exit
PB: predicated region body
PF: predicated region fallthrough
CT: control target
= control target key end

     0   :  { %s2243_s4 = inlined_call_operand.vmem [shape: bf16[128,128], index: 4, kind: input, shape index: {}]   ;;  %s2244_s0 = inlined_call_operand.vmem [shape: f32[128,128], index: 0, kind: input, shape index: {}]   ;;  %s2245_s2 = inlined_call_operand.vmem [shape: f32[1,128], index: 2, kind: input, shape index: {}]   ;;  %s2246_s3 = inlined_call_operand.vmem [shape: f32[1,128], index: 3, kind: input, shape index: {}]   ;;  %s2247_s6 = inlined_call_operand.vmem [shape: bf16[128,128], index: 6, kind: input, shape index: {}]   ;;  %s2248_s5 = inlined_call_operand.vmem [shape: f32[1,128], index: 5, kind: input, shape index: {}]   ;;  %s2249_s1 = inlined_call_operand.vmem [shape: bf16[128,128], index: 1, kind: input, shape index: {}]   ;;  %s2250_s8 = inlined_call_operand.vmem [shape: bf16[128,128], index: 8, kind: input, shape index: {}]   ;;  %s2251_s7 = inlined_call_operand.vmem [shape: f32[1,128], index: 7, kind: input, shape index: {}]   ;;  %s2252_s9 = inlined_call_operand.vmem [shape: f32[1,128], index: 9, kind: input, shape index: {}]   ;;  %s2253_s10 = inlined_call_operand.vmem [shape: f32[128,128], index: 10, kind: output, shape index: {}]  }
   0x1   :  { %v1297_v0 = vld [vmem:[%s2243_s4] sm:$0xff]   ;;  %v1328_v1 = vld [vmem:[%s2243_s4 + $0x8] sm:$0xff]   ;;  %v1899_v4 = vld [vmem:[%s2244_s0 + $0x10] sm:$0xff] }
   0x2   :  { %1704 = vmatprep.subr.bf16.mxu0 %v1297_v0  ;;  %1736 = vmatprep.subr.bf16.mxu1 %v1297_v0  ;;  %v1889_v2 = vld [vmem:[%s2244_s0] sm:$0xff]  ;;  %v1894_v3 = vld [vmem:[%s2244_s0 + $0x8] sm:$0xff]  ;;  %v1329_v6 = vld [vmem:[%s2243_s4 + $0x10] sm:$0xff]   ;;  %v76_v10 = vmul.f32 %v1899_v4, %v1899_v4 }
   0x3   :  { %1706 = vmatpush3.bf16.msra.mxu0 %v1297_v0  ;;  %1738 = vmatpush3.bf16.msra.mxu1 %v1297_v0  ;;  %v74_v5 = vmul.f32 %v1889_v2, %v1889_v2  ;;  %v1909_v7 = vld [vmem:[%s2244_s0 + $0x18] sm:$0xff]  ;;  %v52_v8 = vadd.f32 %v1894_v3, %v1889_v2  ;;  %v75_v9 = vmul.f32 %v1894_v3, %v1894_v3  ;;  %v1920_v11 = vld [vmem:[%s2244_s0 + $0x20] sm:$0xff]  ;;  %v1931_v16 = vld [vmem:[%s2244_s0 + $0x28] sm:$0xff] }
   0x4   :  { %1708 = vmatprep.subr.bf16.mxu0 %v1328_v1  ;;  %1740 = vmatprep.subr.bf16.mxu1 %v1328_v1  ;;  %v77_v13 = vmul.f32 %v1909_v7, %v1909_v7  ;;  %v1330_v15 = vld [vmem:[%s2243_s4 + $0x18] sm:$0xff]   ;;  %v78_v18 = vmul.f32 %v1920_v11, %v1920_v11  ;;  %v1939_v20 = vld [vmem:[%s2244_s0 + $0x30] sm:$0xff]  ;;  %v79_v22 = vmul.f32 %v1931_v16, %v1931_v16  ;;  %v1331_v24 = vld [vmem:[%s2243_s4 + $0x20] sm:$0xff]  }
   0x5   :  { %v53_v12 = vadd.f32 %v52_v8, %v1899_v4  ;;  %v90_v14 = vadd.f32 %v75_v9, %v74_v5  ;;  %v1950_v25 = vld [vmem:[%s2244_s0 + $0x38] sm:$0xff]  ;;  %v80_v27 = vmul.f32 %v1939_v20, %v1939_v20  ;;  %v1958_v29 = vld [vmem:[%s2244_s0 + $0x40] sm:$0xff]  ;;  %v1332_v33 = vld [vmem:[%s2243_s4 + $0x28] sm:$0xff]  }
   0x6   :  { %v81_v31 = vmul.f32 %v1950_v25, %v1950_v25  ;;  %v1969_v34 = vld [vmem:[%s2244_s0 + $0x48] sm:$0xff]  ;;  %v82_v36 = vmul.f32 %v1958_v29, %v1958_v29  ;;  %v1977_v38 = vld [vmem:[%s2244_s0 + $0x50] sm:$0xff]  ;;  %v1988_v43 = vld [vmem:[%s2244_s0 + $0x58] sm:$0xff] }
   0x7   :  { %1710 = vmatpush3.bf16.msra.mxu0 %v1328_v1  ;;  %v54_v17 = vadd.f32 %v53_v12, %v1909_v7  ;;  %1742 = vmatpush3.bf16.msra.mxu1 %v1328_v1  ;;  %v91_v19 = vadd.f32 %v90_v14, %v76_v10  ;;  %v83_v40 = vmul.f32 %v1969_v34, %v1969_v34  ;;  %v1333_v42 = vld [vmem:[%s2243_s4 + $0x30] sm:$0xff]   ;;  %v1996_v47 = vld [vmem:[%s2244_s0 + $0x60] sm:$0xff]  ;;  %v1334_v51 = vld [vmem:[%s2243_s4 + $0x38] sm:$0xff]  }
   0x8   :  { %1712 = vmatprep.subr.bf16.mxu0 %v1329_v6  ;;  %1744 = vmatprep.subr.bf16.mxu1 %v1329_v6  ;;  %v84_v45 = vmul.f32 %v1977_v38, %v1977_v38  ;;  %v85_v49 = vmul.f32 %v1988_v43, %v1988_v43  ;;  %v2007_v52 = vld [vmem:[%s2244_s0 + $0x68] sm:$0xff]  ;;  %v86_v54 = vmul.f32 %v1996_v47, %v1996_v47  ;;  %v2015_v56 = vld [vmem:[%s2244_s0 + $0x70] sm:$0xff]  ;;  %v2023_v60 = vld [vmem:[%s2244_s0 + $0x78] sm:$0xff] }
   0x9   :  { %v55_v21 = vadd.f32 %v54_v17, %v1920_v11  ;;  %v92_v23 = vadd.f32 %v91_v19, %v77_v13  ;;  %v87_v58 = vmul.f32 %v2007_v52, %v2007_v52  ;;  %v88_v62 = vmul.f32 %v2015_v56, %v2015_v56 }
   0xa   :  { %v89_v1 = vmul.f32 %v2023_v60, %v2023_v60 }
   0xb   :  { %1714 = vmatpush3.bf16.msra.mxu0 %v1329_v6  ;;  %v56_v26 = vadd.f32 %v55_v21, %v1931_v16  ;;  %1746 = vmatpush3.bf16.msra.mxu1 %v1329_v6  ;;  %v93_v28 = vadd.f32 %v92_v23, %v78_v18 }
   0xc   :  { %1716 = vmatprep.subr.bf16.mxu0 %v1330_v15  ;;  %1748 = vmatprep.subr.bf16.mxu1 %v1330_v15 }
   0xd   :  { %v57_v30 = vadd.f32 %v56_v26, %v1939_v20  ;;  %v94_v32 = vadd.f32 %v93_v28, %v79_v22 }
   0xf   :  { %1718 = vmatpush3.bf16.msra.mxu0 %v1330_v15  ;;  %v58_v35 = vadd.f32 %v57_v30, %v1950_v25  ;;  %1750 = vmatpush3.bf16.msra.mxu1 %v1330_v15  ;;  %v95_v37 = vadd.f32 %v94_v32, %v80_v27 }
  0x10   :  { %1720 = vmatprep.subr.bf16.mxu0 %v1331_v24  ;;  %1752 = vmatprep.subr.bf16.mxu1 %v1331_v24 }
  0x11   :  { %v59_v39 = vadd.f32 %v58_v35, %v1958_v29  ;;  %v96_v41 = vadd.f32 %v95_v37, %v81_v31 }
  0x13   :  { %1722 = vmatpush3.bf16.msra.mxu0 %v1331_v24  ;;  %v60_v44 = vadd.f32 %v59_v39, %v1969_v34  ;;  %1754 = vmatpush3.bf16.msra.mxu1 %v1331_v24  ;;  %v97_v46 = vadd.f32 %v96_v41, %v82_v36  ;;  %v115_v36 = vld [vmem:[%s2245_s2] sm:$0x1] }
  0x14   :  { %1724 = vmatprep.subr.bf16.mxu0 %v1332_v33  ;;  %1756 = vmatprep.subr.bf16.mxu1 %v1332_v33 }
  0x15   :  { %v61_v48 = vadd.f32 %v60_v44, %v1977_v38  ;;  %v98_v50 = vadd.f32 %v97_v46, %v83_v40 }
  0x17   :  { %1726 = vmatpush3.bf16.msra.mxu0 %v1332_v33  ;;  %v62_v53 = vadd.f32 %v61_v48, %v1988_v43  ;;  %1758 = vmatpush3.bf16.msra.mxu1 %v1332_v33  ;;  %v99_v55 = vadd.f32 %v98_v50, %v84_v45  ;;  %v122_v33 = vlaneseq  ;;  %v119_v45 = vld [vmem:[%s2246_s3] sm:$0x1] }
  0x18   :  { %1728 = vmatprep.subr.bf16.mxu0 %v1333_v42  ;;  %1760 = vmatprep.subr.bf16.mxu1 %v1333_v42 }
  0x19   :  { %v63_v57 = vadd.f32 %v62_v53, %v1996_v47  ;;  %v100_v59 = vadd.f32 %v99_v55, %v85_v49  ;;  %v2032_v35 = vshrl.u32 %v122_v33, 7  ;;  %v2037_v37 = vand.u32 127, %v122_v33 }
  0x1b   :  { %1730 = vmatpush3.bf16.msra.mxu0 %v1333_v42  ;;  %v64_v61 = vadd.f32 %v63_v57, %v2007_v52  ;;  %1762 = vmatpush3.bf16.msra.mxu1 %v1333_v42  ;;  %v101_v63 = vadd.f32 %v100_v59, %v86_v54  ;;  %v2040_v39 = vsub.s32 0, %v2032_v35  ;;  %v124_v40 = vadd.s32 8, %v2032_v35 }
  0x1c   :  { %1732 = vmatprep.subr.bf16.mxu0 %v1334_v51  ;;  %1764 = vmatprep.subr.bf16.mxu1 %v1334_v51  ;;  %v125_v42 = vadd.s32 16, %v2032_v35  ;;  %vm141_vm0 = vcmp.eq.s32.totalorder %v2032_v35, %v2037_v37  ;;  %v126_v48 = vadd.s32 24, %v2032_v35  ;;  %v127_v50 = vadd.s32 32, %v2032_v35 }
  0x1d   :  { %v65_v0 = vadd.f32 %v64_v61, %v2015_v56  ;;  %v102_v5 = vadd.f32 %v101_v63, %v87_v58  ;;  %vm142_vm1 = vcmp.eq.s32.totalorder %v124_v40, %v2037_v37  ;;  %v128_v53 = vadd.s32 40, %v2032_v35 }
  0x1e   :  { %vm143_vm2 = vcmp.eq.s32.totalorder %v125_v42, %v2037_v37  ;;  %vm144_vm3 = vcmp.eq.s32.totalorder %v126_v48, %v2037_v37  ;;  %vm145_vm4 = vcmp.eq.s32.totalorder %v127_v50, %v2037_v37  ;;  %v129_v55 = vadd.s32 48, %v2032_v35 }
  0x1f   :  { %1734 = vmatpush3.bf16.msra.mxu0 %v1334_v51  ;;  %v66_v6 = vadd.f32 %v65_v0, %v2023_v60  ;;  %1766 = vmatpush3.bf16.msra.mxu1 %v1334_v51  ;;  %v103_v8 = vadd.f32 %v102_v5, %v88_v62  ;;  %vm146_vm5 = vcmp.eq.s32.totalorder %v128_v53, %v2037_v37  ;;  %v130_v57 = vadd.s32 56, %v2032_v35 }
  0x20   :  { %vm147_vm6 = vcmp.eq.s32.totalorder %v129_v55, %v2037_v37  ;;  %v131_v58 = vadd.s32 64, %v2032_v35  ;;  %v132_v59 = vadd.s32 72, %v2032_v35  ;;  %v133_v61 = vadd.s32 80, %v2032_v35 }
  0x21   :  { %v67_v9 = vrot.slane %v66_v6, 4  ;;  %v104_v10 = vadd.f32 %v103_v8, %v89_v1  ;;  %vm148_vm7 = vcmp.eq.s32.totalorder %v130_v57, %v2037_v37  ;;  %v134_v62 = vadd.s32 88, %v2032_v35  ;;  %v1767_v8 = vld [vmem:[%s2247_s6] sm:$0xff]  }
  0x22   :  { %vm149_vm8 = vcmp.eq.s32.totalorder %v131_v58, %v2037_v37  ;;  %vm150_vm9 = vcmp.eq.s32.totalorder %v132_v59, %v2037_v37  ;;  %vm151_vm10 = vcmp.eq.s32.totalorder %v133_v61, %v2037_v37  ;;  %v135_v63 = vadd.s32 96, %v2032_v35  ;;  %1607 = vmatprep.subr.bf16.mxu1 %v1767_v8 }
  0x23   :  { %v68_v12 = vadd.f32 %v67_v9, %v66_v6  ;;  %v105_v13 = vrot.slane %v104_v10, 4  ;;  %vm152_vm11 = vcmp.eq.s32.totalorder %v134_v62, %v2037_v37  ;;  %v136_v0 = vadd.s32 104, %v2032_v35  ;;  %v1768_v9 = vld [vmem:[%s2247_s6 + $0x8] sm:$0xff]  }
  0x24   :  { %vm153_vm12 = vcmp.eq.s32.totalorder %v135_v63, %v2037_v37  ;;  %v137_v1 = vadd.s32 112, %v2032_v35  ;;  %v138_v5 = vadd.s32 120, %v2032_v35  ;;  %v546_v6 = vpack.c.bf16 %v1894_v3, %v1889_v2  ;;  %v1770_v2 = vld [vmem:[%s2247_s6 + $0x18] sm:$0xff]   ;;  %v1771_v3 = vld [vmem:[%s2247_s6 + $0x20] sm:$0xff]  }
  0x25   :  { %v69_v14 = vrot.slane %v68_v12, 2  ;;  %v106_v15 = vadd.f32 %v105_v13, %v104_v10  ;;  %vm154_vm13 = vcmp.eq.s32.totalorder %v136_v0, %v2037_v37  ;;  %v1769_v10 = vld [vmem:[%s2247_s6 + $0x10] sm:$0xff]  }
  0x26   :  { %vm155_vm14 = vcmp.eq.s32.totalorder %v137_v1, %v2037_v37  ;;  %vm156_vm15 = vcmp.eq.s32.totalorder %v138_v5, %v2037_v37 }
  0x27   :  { %v70_v17 = vadd.f32 %v69_v14, %v68_v12  ;;  %v107_v18 = vrot.slane %v106_v15, 2  ;;  %v1772_v12 = vld [vmem:[%s2247_s6 + $0x28] sm:$0xff]  }
  0x29   :  { %v71_v19 = vrot.slane %v70_v17, 1  ;;  %v108_v21 = vadd.f32 %v107_v18, %v106_v15 }
  0x2b   :  { %v72_v22 = vadd.f32 %v71_v19, %v70_v17  ;;  %v109_v23 = vrot.slane %v108_v21, 1 }
  0x2d   :  { %v73_v24 = vmul.f32 0.015625, %v72_v22  ;;  %v110_v26 = vadd.f32 %v109_v23, %v108_v21 }
  0x2f   :  { %v112_v27 = vmul.f32 %v73_v24, %v73_v24  ;;  %v111_v28 = vmul.f32 0.015625, %v110_v26 }
  0x31   :  { %v113_v30 = vsub.f32 %v111_v28, %v112_v27 }
  0x33   :  { %v114_v31 = vmax.f32 %v113_v30, 0.0 }
  0x35   :  { %v116_v32 = vadd.f32 1e-05, %v114_v31 }
  0x37   :  { %1791 = vrsqrt.f32 %v116_v32 }
  0x41   :  { %v1792_v41 = vpop.eup %1791 }
  0x42   :  { %v118_v44 = vmul.f32 %v1792_v41, %v115_v36 }
  0x44   :  { %v193_v46 = vrot.slane %v118_v44, %v2040_v39  ;;  %v120_v49 = vmul.f32 %v118_v44, %v73_v24 }
  0x46   :  { %1495 = vmatprep.mubr.msk.f32.mxu0 %vm141_vm0, %v193_v46  ;;  %v121_v51 = vsub.f32 %v119_v45, %v120_v49 }
  0x47   :  { %1496 = vmatmul.mubr.msk.f32.vlgmr.msra.gmra.mrb[0].mxu0 %vm142_vm1, %v193_v46 }
  0x48   :  { %1498 = vmatprep.mubr.msk.f32.mxu0 %vm143_vm2, %v193_v46  ;;  %v361_v54 = vrot.slane %v121_v51, %v2040_v39 }
  0x4a   :  { %1551 = vmatprep.mubr.msk.f32.mxu1 %vm141_vm0, %v361_v54 }
  0x4b   :  { %1499 = vmatmul.mubr.msk.f32.gmra.mrb[2].mxu0 %vm144_vm3, %v193_v46  ;;  %1552 = vmatmul.mubr.msk.f32.vlgmr.msra.gmra.mrb[0].mxu1 %vm142_vm1, %v361_v54 }
  0x4c   :  { %1501 = vmatprep.mubr.msk.f32.mxu0 %vm145_vm4, %v193_v46  ;;  %1554 = vmatprep.mubr.msk.f32.mxu1 %vm143_vm2, %v361_v54 }
  0x4d   :  { %1608 = vmatpush3.bf16.msra.mxu1 %v1767_v8 }
  0x4e   :  { %1609 = vmatprep.subr.bf16.mxu1 %v1768_v9 }
  0x4f   :  { %1502 = vmatmul.mubr.msk.f32.gmra.mrb[4].mxu0 %vm146_vm5, %v193_v46  ;;  %1555 = vmatmul.mubr.msk.f32.gmra.mrb[2].mxu1 %vm144_vm3, %v361_v54 }
  0x50   :  { %1504 = vmatprep.mubr.msk.f32.mxu0 %vm147_vm6, %v193_v46  ;;  %1557 = vmatprep.mubr.msk.f32.mxu1 %vm145_vm4, %v361_v54 }
  0x51   :  { %1610 = vmatpush3.bf16.msra.mxu1 %v1768_v9 }
  0x52   :  { %1611 = vmatprep.subr.bf16.mxu1 %v1769_v10 }
  0x53   :  { %1505 = vmatmul.mubr.msk.f32.gmra.mrb[6].mxu0 %vm148_vm7, %v193_v46  ;;  %1558 = vmatmul.mubr.msk.f32.gmra.mrb[4].mxu1 %vm146_vm5, %v361_v54 }
  0x54   :  { %1507 = vmatprep.mubr.msk.f32.mxu0 %vm149_vm8, %v193_v46  ;;  %1560 = vmatprep.mubr.msk.f32.mxu1 %vm147_vm6, %v361_v54 }
  0x55   :  { %1612 = vmatpush3.bf16.msra.mxu1 %v1769_v10 }
  0x56   :  { %1613 = vmatprep.subr.bf16.mxu1 %v1770_v2 }
  0x57   :  { %1508 = vmatmul.mubr.msk.f32.gmra.mrb[8].mxu0 %vm150_vm9, %v193_v46  ;;  %1561 = vmatmul.mubr.msk.f32.gmra.mrb[6].mxu1 %vm148_vm7, %v361_v54 }
  0x58   :  { %1510 = vmatprep.mubr.msk.f32.mxu0 %vm151_vm10, %v193_v46  ;;  %1563 = vmatprep.mubr.msk.f32.mxu1 %vm149_vm8, %v361_v54 }
  0x59   :  { %1614 = vmatpush3.bf16.msra.mxu1 %v1770_v2 }
  0x5a   :  { %1615 = vmatprep.subr.bf16.mxu1 %v1771_v3 }
  0x5b   :  { %1511 = vmatmul.mubr.msk.f32.gmra.mrb[10].mxu0 %vm152_vm11, %v193_v46  ;;  %1564 = vmatmul.mubr.msk.f32.gmra.mrb[8].mxu1 %vm150_vm9, %v361_v54 }
  0x5c   :  { %1513 = vmatprep.mubr.msk.f32.mxu0 %vm153_vm12, %v193_v46  ;;  %1566 = vmatprep.mubr.msk.f32.mxu1 %vm151_vm10, %v361_v54 }
  0x5d   :  { %1616 = vmatpush3.bf16.msra.mxu1 %v1771_v3 }
  0x5e   :  { %1617 = vmatprep.subr.bf16.mxu1 %v1772_v12 }
  0x5f   :  { %1514 = vmatmul.mubr.msk.f32.gmra.mrb[12].mxu0 %vm154_vm13, %v193_v46  ;;  %1567 = vmatmul.mubr.msk.f32.gmra.mrb[10].mxu1 %vm152_vm11, %v361_v54 }
  0x60   :  { %1516 = vmatprep.mubr.msk.f32.mxu0 %vm155_vm14, %v193_v46  ;;  %1569 = vmatprep.mubr.msk.f32.mxu1 %vm153_vm12, %v361_v54 }
  0x61   :  { %1618 = vmatpush3.bf16.msra.mxu1 %v1772_v12 }
  0x63   :  { %1517 = vmatmul.mubr.msk.f32.gmra.mrb[14].mxu0 %vm156_vm15, %v193_v46  ;;  %1570 = vmatmul.mubr.msk.f32.gmra.mrb[12].mxu1 %vm154_vm13, %v361_v54 }
  0x64   :  { %1572 = vmatprep.mubr.msk.f32.mxu1 %vm155_vm14, %v361_v54  ;;  %1591 = vmatprep.mubr.bf16.mxu0 %v546_v6 }
  0x67   :  { %1573 = vmatmul.mubr.msk.f32.gmra.mrb[14].mxu1 %vm156_vm15, %v361_v54 }
 0x11a   :  { %v1497_v13 = vpop.f32.mrb[0].mxu0 }
 0x11b   :  { %v277_v14 = vpop.f32.mrb[1].mxu0 }
 0x11c   :  { %v554_v15 = vpack.c.bf16 %v1497_v13, %v277_v14  ;;  %v547_v14 = vpack.c.bf16 %v1909_v7, %v1899_v4  ;;  %v551_v4 = vpack.c.bf16 %v1988_v43, %v1977_v38  ;;  %v552_v7 = vpack.c.bf16 %v2007_v52, %v1996_v47  ;;  %v356_v52 = vld [vmem:[%s2248_s5] sm:$0x1] }
 0x11e   :  { %v1500_v17 = vpop.f32.mrb[2].mxu0  ;;  %1575 = vmatprep.subr.bf16.mxu0 %v554_v15  ;;  %v1553_v18 = vpop.f32.mrb[0].mxu1 }
 0x11f   :  { %v287_v19 = vpop.f32.mrb[3].mxu0  ;;  %1576 = vmatpush3.bf16.msra.mxu0 %v554_v15  ;;  %v445_v21 = vpop.f32.mrb[1].mxu1 }
 0x120   :  { %v555_v22 = vpack.c.bf16 %v1500_v17, %v287_v19  ;;  %v524_v23 = vadd.f32 %v1553_v18, %v445_v21  ;;  %v548_v18 = vpack.c.bf16 %v1931_v16, %v1920_v11  ;;  %v553_v11 = vpack.c.bf16 %v2023_v60, %v2015_v56  ;;  %v1773_v16 = vld [vmem:[%s2247_s6 + $0x30] sm:$0xff]  }
 0x121   :  { %1619 = vmatprep.subr.bf16.mxu1 %v1773_v16 }
 0x122   :  { %v1503_v24 = vpop.f32.mrb[4].mxu0  ;;  %1577 = vmatprep.subr.bf16.mxu0 %v555_v22  ;;  %v1556_v26 = vpop.f32.mrb[2].mxu1  ;;  %1620 = vmatpush3.bf16.msra.mxu1 %v1773_v16 }
 0x123   :  { %v297_v27 = vpop.f32.mrb[5].mxu0  ;;  %1578 = vmatpush3.bf16.msra.mxu0 %v555_v22  ;;  %v455_v28 = vpop.f32.mrb[3].mxu1 }
 0x124   :  { %v556_v30 = vpack.c.bf16 %v1503_v24, %v297_v27  ;;  %v525_v31 = vadd.f32 %v524_v23, %v455_v28  ;;  %v549_v23 = vpack.c.bf16 %v1950_v25, %v1939_v20  ;;  %v550_v24 = vpack.c.bf16 %v1969_v34, %v1958_v29  ;;  %v1774_v20 = vld [vmem:[%s2247_s6 + $0x38] sm:$0xff]  }
 0x125   :  { %1621 = vmatprep.subr.bf16.mxu1 %v1774_v20 }
 0x126   :  { %v1506_v32 = vpop.f32.mrb[6].mxu0  ;;  %1579 = vmatprep.subr.bf16.mxu0 %v556_v30  ;;  %v1559_v33 = vpop.f32.mrb[4].mxu1  ;;  %v526_v35 = vadd.f32 %v1556_v26, %v525_v31  ;;  %1622 = vmatpush3.bf16.msra.mxu1 %v1774_v20 }
 0x127   :  { %v307_v36 = vpop.f32.mrb[7].mxu0  ;;  %1580 = vmatpush3.bf16.msra.mxu0 %v556_v30  ;;  %v465_v37 = vpop.f32.mrb[5].mxu1 }
 0x128   :  { %v557_v40 = vpack.c.bf16 %v1506_v32, %v307_v36  ;;  %v527_v41 = vadd.f32 %v526_v35, %v465_v37 }
 0x12a   :  { %v1509_v42 = vpop.f32.mrb[8].mxu0  ;;  %1581 = vmatprep.subr.bf16.mxu0 %v557_v40  ;;  %v1562_v44 = vpop.f32.mrb[6].mxu1  ;;  %v528_v45 = vadd.f32 %v1559_v33, %v527_v41 }
 0x12b   :  { %v317_v46 = vpop.f32.mrb[9].mxu0  ;;  %1582 = vmatpush3.bf16.msra.mxu0 %v557_v40  ;;  %v475_v48 = vpop.f32.mrb[7].mxu1 }
 0x12c   :  { %v558_v49 = vpack.c.bf16 %v1509_v42, %v317_v46  ;;  %v529_v50 = vadd.f32 %v528_v45, %v475_v48 }
 0x12e   :  { %v1512_v51 = vpop.f32.mrb[10].mxu0  ;;  %1583 = vmatprep.subr.bf16.mxu0 %v558_v49  ;;  %v1565_v53 = vpop.f32.mrb[8].mxu1  ;;  %v530_v54 = vadd.f32 %v1562_v44, %v529_v50 }
 0x12f   :  { %v327_v55 = vpop.f32.mrb[11].mxu0  ;;  %1584 = vmatpush3.bf16.msra.mxu0 %v558_v49  ;;  %v485_v57 = vpop.f32.mrb[9].mxu1 }
 0x130   :  { %v559_v58 = vpack.c.bf16 %v1512_v51, %v327_v55  ;;  %v531_v59 = vadd.f32 %v530_v54, %v485_v57 }
 0x132   :  { %v1515_v61 = vpop.f32.mrb[12].mxu0  ;;  %1585 = vmatprep.subr.bf16.mxu0 %v559_v58  ;;  %v1568_v62 = vpop.f32.mrb[10].mxu1  ;;  %v532_v63 = vadd.f32 %v1565_v53, %v531_v59 }
 0x133   :  { %v337_v0 = vpop.f32.mrb[13].mxu0  ;;  %1586 = vmatpush3.bf16.msra.mxu0 %v559_v58  ;;  %v495_v1 = vpop.f32.mrb[11].mxu1 }
 0x134   :  { %v560_v5 = vpack.c.bf16 %v1515_v61, %v337_v0  ;;  %v533_v6 = vadd.f32 %v532_v63, %v495_v1 }
 0x136   :  { %v1518_v8 = vpop.f32.mrb[14].mxu0  ;;  %1587 = vmatprep.subr.bf16.mxu0 %v560_v5  ;;  %v1571_v9 = vpop.f32.mrb[12].mxu1  ;;  %v534_v10 = vadd.f32 %v1568_v62, %v533_v6 }
 0x137   :  { %v347_v2 = vpop.f32.mrb[15].mxu0  ;;  %1588 = vmatpush3.bf16.msra.mxu0 %v560_v5  ;;  %v505_v3 = vpop.f32.mrb[13].mxu1 }
 0x138   :  { %v561_v12 = vpack.c.bf16 %v1518_v8, %v347_v2  ;;  %v535_v13 = vadd.f32 %v534_v10, %v505_v3 }
 0x13a   :  { %1589 = vmatprep.subr.bf16.mxu0 %v561_v12  ;;  %v1574_v15 = vpop.f32.mrb[14].mxu1  ;;  %v536_v17 = vadd.f32 %v1571_v9, %v535_v13 }
 0x13b   :  { %1590 = vmatpush3.bf16.msra.mxu0 %v561_v12  ;;  %v515_v19 = vpop.f32.mrb[15].mxu1 }
 0x13c   :  { %v537_v21 = vadd.f32 %v536_v17, %v515_v19 }
 0x13e   :  { %1592 = vmatmul.mubr.bf16.vlgmr.msra.gmra.mrb[16].mxu0 %v547_v14  ;;  %v538_v22 = vadd.f32 %v1574_v15, %v537_v21 }
 0x13f   :  { %1595 = vmatprep.mubr.bf16.mxu0 %v548_v18 }
 0x140   :  { %v539_v25 = vrot.slane %v538_v22, 4 }
 0x142   :  { %v540_v29 = vadd.f32 %v539_v25, %v538_v22 }
 0x144   :  { %v541_v34 = vrot.slane %v540_v29, 2 }
 0x146   :  { %1596 = vmatmul.mubr.bf16.gmra.mrb[20].mxu0 %v549_v23  ;;  %v542_v38 = vadd.f32 %v541_v34, %v540_v29  ;;  %v1775_v29 = vld [vmem:[%s2249_s1] sm:$0xff]  }
 0x147   :  { %1599 = vmatprep.mubr.bf16.mxu0 %v550_v24  ;;  %v1783_v34 = vld [vmem:[%s2250_s8] sm:$0xff]  }
 0x148   :  { %v543_v43 = vrot.slane %v542_v38, 1  ;;  %1671 = vmatprep.subr.bf16.mxu1 %v1783_v34 }
 0x14a   :  { %v544_v47 = vadd.f32 %v543_v43, %v542_v38  ;;  %v1784_v38 = vld [vmem:[%s2250_s8 + $0x8] sm:$0xff]   ;;  %v1785_v43 = vld [vmem:[%s2250_s8 + $0x10] sm:$0xff]  }
 0x14c   :  { %v545_v56 = vadd.f32 %v544_v47, %v356_v52 }
 0x14e   :  { %1600 = vmatmul.mubr.bf16.gmra.mrb[24].mxu0 %v551_v4  ;;  %v566_v60 = vrot.slane %v545_v56, %v2040_v39 }
 0x14f   :  { %1603 = vmatprep.mubr.bf16.mxu0 %v552_v7 }
 0x156   :  { %1604 = vmatmul.mubr.bf16.gmra.mrb[28].mxu0 %v553_v11 }
 0x157   :  { %1655 = vmatprep.mubr.bf16.mxu0 %v1775_v29 }
 0x211   :  { %v1593_v26 = vpop.f32.mrb[16].mxu0 }
 0x212   :  { %v611_v27 = vadd.f32 %v1593_v26, %v566_v60  ;;  %v602_v28 = vpop.f32.mrb[17].mxu0 }
 0x213   :  { %v603_v30 = vadd.f32 %v602_v28, %v566_v60  ;;  %v1594_v31 = vpop.f32.mrb[18].mxu0 }
 0x214   :  { %v614_v32 = vadd.f32 %v1594_v31, %v566_v60  ;;  %v605_v33 = vpop.f32.mrb[19].mxu0  ;;  %v667_v36 = vmax.f32 %v611_v27, 0.0 }
 0x215   :  { %v606_v35 = vadd.f32 %v605_v33, %v566_v60  ;;  %v665_v40 = vmax.f32 %v603_v30, 0.0 }
 0x216   :  { %v668_v37 = vmax.f32 %v614_v32, 0.0 }
 0x217   :  { %v666_v41 = vmax.f32 %v606_v35, 0.0 }
 0x218   :  { %v682_v42 = vpack.c.bf16 %v668_v37, %v667_v36 }
 0x219   :  { %v681_v44 = vpack.c.bf16 %v666_v41, %v665_v40  ;;  %v1597_v45 = vpop.f32.mrb[20].mxu0 }
 0x21a   :  { %v627_v46 = vadd.f32 %v1597_v45, %v566_v60  ;;  %v618_v48 = vpop.f32.mrb[21].mxu0 }
 0x21b   :  { %v619_v49 = vadd.f32 %v618_v48, %v566_v60  ;;  %v1598_v50 = vpop.f32.mrb[22].mxu0  ;;  %1623 = vmatprep.mubr.bf16.mxu1 %v681_v44 }
 0x21c   :  { %v630_v39 = vadd.f32 %v1598_v50, %v566_v60  ;;  %v621_v51 = vpop.f32.mrb[23].mxu0  ;;  %1624 = vmatmul.mubr.bf16.vlgmr.msra.gmra.mrb[16].mxu1 %v682_v42  ;;  %v671_v54 = vmax.f32 %v627_v46, 0.0 }
 0x21d   :  { %v622_v53 = vadd.f32 %v621_v51, %v566_v60  ;;  %v669_v57 = vmax.f32 %v619_v49, 0.0  ;;  %1672 = vmatpush3.bf16.msra.mxu1 %v1783_v34  ;;  %v1776_v51 = vld [vmem:[%s2249_s1 + $0x8] sm:$0xff]  }
 0x21e   :  { %v672_v55 = vmax.f32 %v630_v39, 0.0  ;;  %1673 = vmatprep.subr.bf16.mxu1 %v1784_v38 }
 0x21f   :  { %v670_v58 = vmax.f32 %v622_v53, 0.0  ;;  %v1777_v53 = vld [vmem:[%s2249_s1 + $0x10] sm:$0xff]  }
 0x220   :  { %v684_v59 = vpack.c.bf16 %v672_v55, %v671_v54  ;;  %v1778_v54 = vld [vmem:[%s2249_s1 + $0x18] sm:$0xff]   ;;  %v1779_v55 = vld [vmem:[%s2249_s1 + $0x20] sm:$0xff]  }
 0x221   :  { %v683_v61 = vpack.c.bf16 %v670_v58, %v669_v57  ;;  %v1601_v62 = vpop.f32.mrb[24].mxu0  ;;  %1674 = vmatpush3.bf16.msra.mxu1 %v1784_v38  ;;  %v1780_v57 = vld [vmem:[%s2249_s1 + $0x28] sm:$0xff]   ;;  %v1781_v58 = vld [vmem:[%s2249_s1 + $0x30] sm:$0xff]  }
 0x222   :  { %v643_v63 = vadd.f32 %v1601_v62, %v566_v60  ;;  %v634_v0 = vpop.f32.mrb[25].mxu0  ;;  %1675 = vmatprep.subr.bf16.mxu1 %v1785_v43  ;;  %v1787_v62 = vld [vmem:[%s2250_s8 + $0x20] sm:$0xff]  }
 0x223   :  { %v635_v1 = vadd.f32 %v634_v0, %v566_v60  ;;  %v1602_v5 = vpop.f32.mrb[26].mxu0  ;;  %1627 = vmatprep.mubr.bf16.mxu1 %v683_v61  ;;  %v1786_v61 = vld [vmem:[%s2250_s8 + $0x18] sm:$0xff]   ;;  %v1789_v0 = vld [vmem:[%s2250_s8 + $0x30] sm:$0xff]  }
 0x224   :  { %v646_v6 = vadd.f32 %v1602_v5, %v566_v60  ;;  %v637_v8 = vpop.f32.mrb[27].mxu0  ;;  %1628 = vmatmul.mubr.bf16.gmra.mrb[20].mxu1 %v684_v59  ;;  %v675_v10 = vmax.f32 %v643_v63, 0.0  ;;  %v1782_v59 = vld [vmem:[%s2249_s1 + $0x38] sm:$0xff]   ;;  %v1788_v63 = vld [vmem:[%s2250_s8 + $0x28] sm:$0xff]   ;;  %v1278_v5 = vld [vmem:[%s2251_s7] ss:$0 sm:$0xff] }
 0x225   :  { %v638_v9 = vadd.f32 %v637_v8, %v566_v60  ;;  %v673_v3 = vmax.f32 %v635_v1, 0.0  ;;  %1676 = vmatpush3.bf16.msra.mxu1 %v1785_v43  ;;  %v1790_v1 = vld [vmem:[%s2250_s8 + $0x38] sm:$0xff]  }
 0x226   :  { %v676_v2 = vmax.f32 %v646_v6, 0.0  ;;  %1677 = vmatprep.subr.bf16.mxu1 %v1786_v61 }
 0x227   :  { %v674_v12 = vmax.f32 %v638_v9, 0.0 }
 0x228   :  { %v686_v13 = vpack.c.bf16 %v676_v2, %v675_v10 }
 0x229   :  { %v685_v14 = vpack.c.bf16 %v674_v12, %v673_v3  ;;  %v1605_v15 = vpop.f32.mrb[28].mxu0  ;;  %1678 = vmatpush3.bf16.msra.mxu1 %v1786_v61 }
 0x22a   :  { %v659_v17 = vadd.f32 %v1605_v15, %v566_v60  ;;  %v650_v18 = vpop.f32.mrb[29].mxu0  ;;  %1679 = vmatprep.subr.bf16.mxu1 %v1787_v62 }
 0x22b   :  { %v651_v19 = vadd.f32 %v650_v18, %v566_v60  ;;  %v1606_v21 = vpop.f32.mrb[30].mxu0  ;;  %1631 = vmatprep.mubr.bf16.mxu1 %v685_v14 }
 0x22c   :  { %v662_v22 = vadd.f32 %v1606_v21, %v566_v60  ;;  %v653_v23 = vpop.f32.mrb[31].mxu0  ;;  %1632 = vmatmul.mubr.bf16.gmra.mrb[24].mxu1 %v686_v13  ;;  %v679_v4 = vmax.f32 %v659_v17, 0.0 }
 0x22d   :  { %v654_v24 = vadd.f32 %v653_v23, %v566_v60  ;;  %v677_v11 = vmax.f32 %v651_v19, 0.0  ;;  %1680 = vmatpush3.bf16.msra.mxu1 %v1787_v62 }
 0x22e   :  { %v680_v7 = vmax.f32 %v662_v22, 0.0  ;;  %1681 = vmatprep.subr.bf16.mxu1 %v1788_v63 }
 0x22f   :  { %v678_v16 = vmax.f32 %v654_v24, 0.0 }
 0x230   :  { %v688_v20 = vpack.c.bf16 %v680_v7, %v679_v4 }
 0x231   :  { %v687_v25 = vpack.c.bf16 %v678_v16, %v677_v11  ;;  %1682 = vmatpush3.bf16.msra.mxu1 %v1788_v63 }
 0x232   :  { %1683 = vmatprep.subr.bf16.mxu1 %v1789_v0 }
 0x233   :  { %1635 = vmatprep.mubr.bf16.mxu1 %v687_v25 }
 0x234   :  { %1636 = vmatmul.mubr.bf16.gmra.mrb[28].mxu1 %v688_v20 }
 0x235   :  { %1684 = vmatpush3.bf16.msra.mxu1 %v1789_v0 }
 0x236   :  { %1685 = vmatprep.subr.bf16.mxu1 %v1790_v1 }
 0x239   :  { %1686 = vmatpush3.bf16.msra.mxu1 %v1790_v1 }
 0x2ef   :  { %v1625_v47 = vpop.f32.mrb[16].mxu1 }
 0x2f0   :  { %v787_v52 = vpop.f32.mrb[17].mxu1 }
 0x2f1   :  { %v1626_v56 = vpop.f32.mrb[18].mxu1 }
 0x2f2   :  { %v867_v60 = vpack.c.bf16 %v1626_v56, %v1625_v47  ;;  %v790_v26 = vpop.f32.mrb[19].mxu1 }
 0x2f3   :  { %v866_v27 = vpack.c.bf16 %v790_v26, %v787_v52 }
 0x2f5   :  { %1639 = vmatprep.subr.bf16.mxu0 %v866_v27 }
 0x2f6   :  { %1640 = vmatpush3.bf16.msra.mxu0 %v866_v27 }
 0x2f7   :  { %v1629_v28 = vpop.f32.mrb[20].mxu1  ;;  %1641 = vmatprep.subr.bf16.mxu0 %v867_v60 }
 0x2f8   :  { %v803_v30 = vpop.f32.mrb[21].mxu1 }
 0x2f9   :  { %v1630_v31 = vpop.f32.mrb[22].mxu1 }
 0x2fa   :  { %v869_v32 = vpack.c.bf16 %v1630_v31, %v1629_v28  ;;  %v806_v33 = vpop.f32.mrb[23].mxu1  ;;  %1642 = vmatpush3.bf16.msra.mxu0 %v867_v60 }
 0x2fb   :  { %v868_v35 = vpack.c.bf16 %v806_v33, %v803_v30 }
 0x2fd   :  { %1643 = vmatprep.subr.bf16.mxu0 %v868_v35 }
 0x2fe   :  { %1644 = vmatpush3.bf16.msra.mxu0 %v868_v35 }
 0x2ff   :  { %v1633_v36 = vpop.f32.mrb[24].mxu1  ;;  %1645 = vmatprep.subr.bf16.mxu0 %v869_v32 }
 0x300   :  { %v819_v37 = vpop.f32.mrb[25].mxu1 }
 0x301   :  { %v1634_v40 = vpop.f32.mrb[26].mxu1 }
 0x302   :  { %v871_v41 = vpack.c.bf16 %v1634_v40, %v1633_v36  ;;  %v822_v42 = vpop.f32.mrb[27].mxu1  ;;  %1646 = vmatpush3.bf16.msra.mxu0 %v869_v32 }
 0x303   :  { %v870_v44 = vpack.c.bf16 %v822_v42, %v819_v37 }
 0x305   :  { %1647 = vmatprep.subr.bf16.mxu0 %v870_v44 }
 0x306   :  { %1648 = vmatpush3.bf16.msra.mxu0 %v870_v44 }
 0x307   :  { %v1637_v45 = vpop.f32.mrb[28].mxu1  ;;  %1649 = vmatprep.subr.bf16.mxu0 %v871_v41 }
 0x308   :  { %v835_v46 = vpop.f32.mrb[29].mxu1 }
 0x309   :  { %v1638_v48 = vpop.f32.mrb[30].mxu1 }
 0x30a   :  { %v873_v49 = vpack.c.bf16 %v1638_v48, %v1637_v45  ;;  %v838_v50 = vpop.f32.mrb[31].mxu1  ;;  %1650 = vmatpush3.bf16.msra.mxu0 %v871_v41 }
 0x30b   :  { %v872_v39 = vpack.c.bf16 %v838_v50, %v835_v46 }
 0x30d   :  { %1651 = vmatprep.subr.bf16.mxu0 %v872_v39 }
 0x30e   :  { %1652 = vmatpush3.bf16.msra.mxu0 %v872_v39 }
 0x30f   :  { %1653 = vmatprep.subr.bf16.mxu0 %v873_v49 }
 0x312   :  { %1654 = vmatpush3.bf16.msra.mxu0 %v873_v49 }
 0x315   :  { %1656 = vmatmul.mubr.bf16.vlgmr.msra.gmra.mrb[32].mxu0 %v1776_v51 }
 0x316   :  { %1659 = vmatprep.mubr.bf16.mxu0 %v1777_v53 }
 0x31d   :  { %1660 = vmatmul.mubr.bf16.gmra.mrb[36].mxu0 %v1778_v54 }
 0x31e   :  { %1663 = vmatprep.mubr.bf16.mxu0 %v1779_v55 }
 0x325   :  { %1664 = vmatmul.mubr.bf16.gmra.mrb[40].mxu0 %v1780_v57 }
 0x326   :  { %1667 = vmatprep.mubr.bf16.mxu0 %v1781_v58  ;;  %v1287_v58 = vld [vmem:[%s2252_s9] ss:$0 sm:$0xff] }
 0x32d   :  { %1668 = vmatmul.mubr.bf16.gmra.mrb[44].mxu0 %v1782_v59 }
 0x3e8   :  { %v1657_v6 = vpop.f32.mrb[32].mxu0 }
 0x3e9   :  { %v972_v8 = vadd.f32 %v1657_v6, %v1278_v5  ;;  %v963_v9 = vpop.f32.mrb[33].mxu0 }
 0x3ea   :  { %v964_v10 = vadd.f32 %v1278_v5, %v963_v9  ;;  %v1658_v2 = vpop.f32.mrb[34].mxu0 }
 0x3eb   :  { %1793 = vtanh.f32 %v972_v8  ;;  %v975_v3 = vadd.f32 %v1658_v2, %v1278_v5  ;;  %v966_v12 = vpop.f32.mrb[35].mxu0 }
 0x3ec   :  { %1795 = vtanh.f32 %v964_v10  ;;  %v967_v13 = vadd.f32 %v1278_v5, %v966_v12 }
 0x3ed   :  { %1797 = vtanh.f32 %v975_v3 }
 0x3ee   :  { %1799 = vtanh.f32 %v967_v13 }
 0x3f0   :  { %v1661_v14 = vpop.f32.mrb[36].mxu0 }
 0x3f1   :  { %v988_v15 = vadd.f32 %v1661_v14, %v1278_v5  ;;  %v979_v17 = vpop.f32.mrb[37].mxu0 }
 0x3f2   :  { %v980_v18 = vadd.f32 %v1278_v5, %v979_v17  ;;  %v1662_v19 = vpop.f32.mrb[38].mxu0 }
 0x3f3   :  { %1801 = vtanh.f32 %v988_v15  ;;  %v991_v21 = vadd.f32 %v1662_v19, %v1278_v5  ;;  %v982_v22 = vpop.f32.mrb[39].mxu0 }
 0x3f4   :  { %1803 = vtanh.f32 %v980_v18  ;;  %v983_v23 = vadd.f32 %v1278_v5, %v982_v22 }
 0x3f5   :  { %v1794_v24 = vpop.eup %1793  ;;  %1805 = vtanh.f32 %v991_v21 }
 0x3f6   :  { %v1796_v4 = vpop.eup %1795  ;;  %1807 = vtanh.f32 %v983_v23 }
 0x3f7   :  { %v1798_v7 = vpop.eup %1797 }
 0x3f8   :  { %v1800_v11 = vpop.eup %1799  ;;  %v1665_v16 = vpop.f32.mrb[40].mxu0  ;;  %v1043_v20 = vpack.c.bf16 %v1798_v7, %v1794_v24 }
 0x3f9   :  { %v1004_v25 = vadd.f32 %v1665_v16, %v1278_v5  ;;  %v995_v29 = vpop.f32.mrb[41].mxu0  ;;  %v1042_v34 = vpack.c.bf16 %v1800_v11, %v1796_v4 }
 0x3fa   :  { %v996_v38 = vadd.f32 %v1278_v5, %v995_v29  ;;  %v1666_v43 = vpop.f32.mrb[42].mxu0 }
 0x3fb   :  { %1809 = vtanh.f32 %v1004_v25  ;;  %v1007_v47 = vadd.f32 %v1666_v43, %v1278_v5  ;;  %v998_v52 = vpop.f32.mrb[43].mxu0  ;;  %1687 = vmatprep.mubr.bf16.mxu1 %v1042_v34 }
 0x3fc   :  { %1811 = vtanh.f32 %v996_v38  ;;  %v999_v56 = vadd.f32 %v1278_v5, %v998_v52  ;;  %1688 = vmatmul.mubr.bf16.vlgmr.msra.gmra.mrb[32].mxu1 %v1043_v20 }
 0x3fd   :  { %v1802_v60 = vpop.eup %1801  ;;  %1813 = vtanh.f32 %v1007_v47 }
 0x3fe   :  { %v1804_v26 = vpop.eup %1803  ;;  %1815 = vtanh.f32 %v999_v56 }
 0x3ff   :  { %v1806_v27 = vpop.eup %1805 }
 0x400   :  { %v1808_v28 = vpop.eup %1807  ;;  %v1669_v30 = vpop.f32.mrb[44].mxu0  ;;  %v1045_v31 = vpack.c.bf16 %v1806_v27, %v1802_v60 }
 0x401   :  { %v1020_v32 = vadd.f32 %v1669_v30, %v1278_v5  ;;  %v1011_v33 = vpop.f32.mrb[45].mxu0  ;;  %v1044_v35 = vpack.c.bf16 %v1808_v28, %v1804_v26 }
 0x402   :  { %v1012_v36 = vadd.f32 %v1278_v5, %v1011_v33  ;;  %v1670_v37 = vpop.f32.mrb[46].mxu0 }
 0x403   :  { %1817 = vtanh.f32 %v1020_v32  ;;  %v1023_v40 = vadd.f32 %v1670_v37, %v1278_v5  ;;  %v1014_v41 = vpop.f32.mrb[47].mxu0  ;;  %1691 = vmatprep.mubr.bf16.mxu1 %v1044_v35 }
 0x404   :  { %1819 = vtanh.f32 %v1012_v36  ;;  %v1015_v42 = vadd.f32 %v1278_v5, %v1014_v41  ;;  %1692 = vmatmul.mubr.bf16.gmra.mrb[36].mxu1 %v1045_v31 }
 0x405   :  { %v1810_v44 = vpop.eup %1809  ;;  %1821 = vtanh.f32 %v1023_v40 }
 0x406   :  { %v1812_v45 = vpop.eup %1811  ;;  %1823 = vtanh.f32 %v1015_v42 }
 0x407   :  { %v1814_v46 = vpop.eup %1813 }
 0x408   :  { %v1816_v48 = vpop.eup %1815  ;;  %v1047_v49 = vpack.c.bf16 %v1814_v46, %v1810_v44 }
 0x409   :  { %v1046_v50 = vpack.c.bf16 %v1816_v48, %v1812_v45 }
 0x40b   :  { %1695 = vmatprep.mubr.bf16.mxu1 %v1046_v50 }
 0x40c   :  { %1696 = vmatmul.mubr.bf16.gmra.mrb[40].mxu1 %v1047_v49 }
 0x40d   :  { %v1818_v39 = vpop.eup %1817 }
 0x40e   :  { %v1820_v51 = vpop.eup %1819 }
 0x40f   :  { %v1822_v53 = vpop.eup %1821 }
 0x410   :  { %v1824_v54 = vpop.eup %1823  ;;  %v1049_v55 = vpack.c.bf16 %v1822_v53, %v1818_v39 }
 0x411   :  { %v1048_v57 = vpack.c.bf16 %v1824_v54, %v1820_v51 }
 0x413   :  { %1699 = vmatprep.mubr.bf16.mxu1 %v1048_v57 }
 0x414   :  { %1700 = vmatmul.mubr.bf16.gmra.mrb[44].mxu1 %v1049_v55 }
 0x4cf   :  { %v1689_v59 = vpop.f32.mrb[32].mxu1 }
 0x4d0   :  { %v1164_v61 = vadd.f32 %v1689_v59, %v1287_v58  ;;  %v1155_v62 = vpop.f32.mrb[33].mxu1 }
 0x4d1   :  { %v1156_v63 = vadd.f32 %v1287_v58, %v1155_v62  ;;  %v1690_v0 = vpop.f32.mrb[34].mxu1 }
 0x4d2   :  { %1220 = vst [vmem:[%s2253_s10 + $0x10] sm:$0xff] %v1164_v61  ;;  %v1167_v1 = vadd.f32 %v1690_v0, %v1287_v58  ;;  %v1158_v5 = vpop.f32.mrb[35].mxu1 }
 0x4d3   :  { %1218 = vst [vmem:[%s2253_s10] sm:$0xff] %v1156_v63  ;;  %v1159_v6 = vadd.f32 %v1287_v58, %v1158_v5 }
 0x4d4   :  { %1221 = vst [vmem:[%s2253_s10 + $0x18] sm:$0xff] %v1167_v1 }
 0x4d5   :  { %1219 = vst [vmem:[%s2253_s10 + $0x8] sm:$0xff] %v1159_v6 }
 0x4d7   :  { %v1693_v8 = vpop.f32.mrb[36].mxu1 }
 0x4d8   :  { %v1180_v9 = vadd.f32 %v1693_v8, %v1287_v58  ;;  %v1171_v10 = vpop.f32.mrb[37].mxu1 }
 0x4d9   :  { %v1172_v2 = vadd.f32 %v1287_v58, %v1171_v10  ;;  %v1694_v3 = vpop.f32.mrb[38].mxu1 }
 0x4da   :  { %1224 = vst [vmem:[%s2253_s10 + $0x30] sm:$0xff] %v1180_v9  ;;  %v1183_v12 = vadd.f32 %v1694_v3, %v1287_v58  ;;  %v1174_v13 = vpop.f32.mrb[39].mxu1 }
 0x4db   :  { %1222 = vst [vmem:[%s2253_s10 + $0x20] sm:$0xff] %v1172_v2  ;;  %v1175_v14 = vadd.f32 %v1287_v58, %v1174_v13 }
 0x4dc   :  { %1225 = vst [vmem:[%s2253_s10 + $0x38] sm:$0xff] %v1183_v12 }
 0x4dd   :  { %1223 = vst [vmem:[%s2253_s10 + $0x28] sm:$0xff] %v1175_v14 }
 0x4df   :  { %v1697_v15 = vpop.f32.mrb[40].mxu1 }
 0x4e0   :  { %v1196_v17 = vadd.f32 %v1697_v15, %v1287_v58  ;;  %v1187_v18 = vpop.f32.mrb[41].mxu1 }
 0x4e1   :  { %v1188_v19 = vadd.f32 %v1287_v58, %v1187_v18  ;;  %v1698_v21 = vpop.f32.mrb[42].mxu1 }
 0x4e2   :  { %1228 = vst [vmem:[%s2253_s10 + $0x50] sm:$0xff] %v1196_v17  ;;  %v1199_v22 = vadd.f32 %v1698_v21, %v1287_v58  ;;  %v1190_v23 = vpop.f32.mrb[43].mxu1 }
 0x4e3   :  { %1226 = vst [vmem:[%s2253_s10 + $0x40] sm:$0xff] %v1188_v19  ;;  %v1191_v24 = vadd.f32 %v1287_v58, %v1190_v23 }
 0x4e4   :  { %1229 = vst [vmem:[%s2253_s10 + $0x58] sm:$0xff] %v1199_v22 }
 0x4e5   :  { %1227 = vst [vmem:[%s2253_s10 + $0x48] sm:$0xff] %v1191_v24 }
 0x4e7   :  { %v1701_v4 = vpop.f32.mrb[44].mxu1 }
 0x4e8   :  { %v1212_v7 = vadd.f32 %v1701_v4, %v1287_v58  ;;  %v1203_v11 = vpop.f32.mrb[45].mxu1 }
 0x4e9   :  { %v1204_v16 = vadd.f32 %v1287_v58, %v1203_v11  ;;  %v1702_v20 = vpop.f32.mrb[46].mxu1 }
 0x4ea   :  { %1232 = vst [vmem:[%s2253_s10 + $0x70] sm:$0xff] %v1212_v7  ;;  %v1215_v25 = vadd.f32 %v1702_v20, %v1287_v58  ;;  %v1206_v29 = vpop.f32.mrb[47].mxu1 }
 0x4eb   :  { %1230 = vst [vmem:[%s2253_s10 + $0x60] sm:$0xff] %v1204_v16  ;;  %v1207_v34 = vadd.f32 %v1287_v58, %v1206_v29 }
 0x4ec   :  { %1233 = vst [vmem:[%s2253_s10 + $0x78] sm:$0xff] %v1215_v25 }
 0x4ed   :  { %1231 = vst [vmem:[%s2253_s10 + $0x68] sm:$0xff] %v1207_v34 }

</bundles_post_ra>
